<compile_context>
chip_gen: v5e
topology: v5e:2x2
jax: 0.10.0
libtpu: 0.0.40
codegen_flags: <defaults>
</compile_context>

<pallas_src>
import math

import jax
import jax.numpy as jnp
import numpy as np
from jax.experimental import pallas as pl
from jax.experimental.pallas import tpu as pltpu


_VMEM_LIMIT = 32 * 1024 * 1024        # <= scoped VMEM on v5e/v6e/v7x
_VMEM_TILE_BUDGET = 24 * 1024 * 1024  # headroom below the limit for tile sizing


# ---------------------------------------------------------------------------
# Tile-size helpers (VMEM-budget aware, portable across v5e/v6e/v7x)
# ---------------------------------------------------------------------------
def _pick_tile_m(M, e_in, e_out, budget=_VMEM_TILE_BUDGET):
    """Largest M tile s.t. double-buffered x/out tiles + resident W^T fit budget."""
    if M < 8:
        return M
    w_bytes = e_in * e_out * 4
    per_row = 2 * (e_in + e_out) * 4          # double-buffered input + output rows, f32
    tile = (budget - w_bytes) // per_row
    tile = max(8, min(int(tile), 1024, M))
    return max(8, (tile // 8) * 8)            # sublane-aligned


def _pick_k_chunk(K, cap=512):
    """Contraction-dim chunk: lane-aligned (mult of 128) divisor of K, or K itself."""
    if K <= cap:
        return K
    for kc in range(cap, 127, -128):
        if K % kc == 0:
            return kc
    return K


def _pick_group_fused(B, R, K, budget=_VMEM_TILE_BUDGET):
    """(head,batch) slabs per grid step for the fused kernel, or None if K too big."""
    # dbl-buffered q/k/v inputs + dbl-buffered probs/ctx outputs + working set
    per_g = (2 * 3 * R * K + 2 * (R * R + R * K) + 2 * R * R + R * K) * 4
    cap = budget // max(per_g, 1)
    if cap < 1:
        return None
    cap = min(int(cap), 16, B)
    for d in range(cap, 0, -1):
        if B % d == 0:
            return d
    return 1


def _pick_group_chunked(B, R, kc, budget=_VMEM_TILE_BUDGET):
    """(head,batch) slabs per grid step for the chunked fallback path."""
    per_g = (2 * 2 * R * kc + 3 * R * R) * 4  # dbl-buffered q,k (or probs,v) + scores
    cap = max(1, min(budget // max(per_g, 1), 16, B))
    for d in range(int(cap), 0, -1):
        if B % d == 0:
            return d
    return 1


# ---------------------------------------------------------------------------
# Kernels
# ---------------------------------------------------------------------------
def _linear_kernel(x_ref, wt_ref, b_ref, o_ref):
    # o = x @ W^T + b ; wt_ref already holds W^T with shape (E_in, E_out)
    o_ref[...] = (
        jnp.dot(x_ref[...], wt_ref[...], preferred_element_type=jnp.float32)
        + b_ref[...]
    ).astype(o_ref.dtype)


def linear(x, w_t, b):
    """Tiled (over M, 'parallel') linear: (M,E_in) @ (E_in,E_out) + (1,E_out)."""
    M, E_in = x.shape
    E_out = w_t.shape[1]
    tm = _pick_tile_m(M, E_in, E_out)
    return pl.pallas_call(
        _linear_kernel,
        out_shape=jax.ShapeDtypeStruct((M, E_out), jnp.float32),
        grid=(pl.cdiv(M, tm),),
        in_specs=[
            pl.BlockSpec((tm, E_in), lambda i: (i, 0)),
            pl.BlockSpec((E_in, E_out), lambda i: (0, 0)),   # W^T resident
            pl.BlockSpec((1, E_out), lambda i: (0, 0)),
        ],
        out_specs=pl.BlockSpec((tm, E_out), lambda i: (i, 0)),
        compiler_params=pltpu.CompilerParams(
            dimension_semantics=("parallel",),
            vmem_limit_bytes=_VMEM_LIMIT,
        ),
    )(x, w_t, b)


def _attn_fused_kernel(q_ref, k_ref, v_ref, probs_ref, ctx_ref):
    # Per grid step: G (head,batch) slabs with the FULL contraction dim resident.
    # Contract on the LAST dim of both operands (no .T / XLU transpose copy).
    s = jnp.einsum(
        "grk,gsk->grs", q_ref[...], k_ref[...],
        preferred_element_type=jnp.float32,
    )
    m = jnp.max(s, axis=-1, keepdims=True)
    e = jnp.exp(s - m)
    denom = jnp.sum(e, axis=-1, keepdims=True)
    # reciprocal + multiply instead of a vector divide (exact to keep rtol=1e-5).
    p = e * pl.reciprocal(denom, approx=False)
    probs_ref[...] = p.astype(probs_ref.dtype)
    ctx_ref[...] = jnp.einsum(
        "grs,gsk->grk", p, v_ref[...],
        preferred_element_type=jnp.float32,
    ).astype(ctx_ref.dtype)


def _scores_softmax_kernel(q_ref, k_ref, probs_ref, acc_ref):
    # grid = (group of (h,n) slabs, K-chunk);  K-chunk is the reduction axis.
    kc = pl.program_id(1)

    @pl.when(kc == 0)
    def _():
        acc_ref[...] = jnp.zeros_like(acc_ref)

    acc_ref[...] += jnp.einsum(
        "grk,gsk->grs", q_ref[...], k_ref[...],
        preferred_element_type=jnp.float32,
    )

    @pl.when(kc == pl.num_programs(1) - 1)
    def _():
        s = acc_ref[...]
        m = jnp.max(s, axis=-1, keepdims=True)
        e = jnp.exp(s - m)
        denom = jnp.sum(e, axis=-1, keepdims=True)
        probs_ref[...] = (e * pl.reciprocal(denom, approx=False)).astype(probs_ref.dtype)


def _context_kernel(probs_ref, v_ref, ctx_ref):
    # Each (group, K-chunk) grid step writes an independent ctx chunk.
    ctx_ref[...] = jnp.einsum(
        "grs,gsk->grk", probs_ref[...], v_ref[...],
        preferred_element_type=jnp.float32,
    ).astype(ctx_ref.dtype)


def _attention(qh, kh, vh):
    """qh/kh/vh: (B=H*N, R, K=C*Dh) -> probs (B,R,R), ctx (B,R,K)."""
    B, R, K = qh.shape

    G = _pick_group_fused(B, R, K)
    if G is not None:
        # Fused path: scores + softmax + context in one kernel, no probs
        # HBM round-trip between score and context computation.
        probs, ctx = pl.pallas_call(
            _attn_fused_kernel,
            out_shape=(
                jax.ShapeDtypeStruct((B, R, R), jnp.float32),
                jax.ShapeDtypeStruct((B, R, K), jnp.float32),
            ),
            grid=(B // G,),
            in_specs=[
                pl.BlockSpec((G, R, K), lambda g: (g, 0, 0)),
                pl.BlockSpec((G, R, K), lambda g: (g, 0, 0)),
                pl.BlockSpec((G, R, K), lambda g: (g, 0, 0)),
            ],
            out_specs=(
                pl.BlockSpec((G, R, R), lambda g: (g, 0, 0)),
                pl.BlockSpec((G, R, K), lambda g: (g, 0, 0)),
            ),
            compiler_params=pltpu.CompilerParams(
                dimension_semantics=("parallel",),
                vmem_limit_bytes=_VMEM_LIMIT,
            ),
        )(qh, kh, vh)
        return probs, ctx

    # Fallback for very large K = C*Dh: chunk the contraction dimension.
    KC = _pick_k_chunk(K)
    G = _pick_group_chunked(B, R, KC)

    probs = pl.pallas_call(
        _scores_softmax_kernel,
        out_shape=jax.ShapeDtypeStruct((B, R, R), jnp.float32),
        grid=(B // G, K // KC),
        in_specs=[
            pl.BlockSpec((G, R, KC), lambda g, c: (g, 0, c)),
            pl.BlockSpec((G, R, KC), lambda g, c: (g, 0, c)),
        ],
        out_specs=pl.BlockSpec((G, R, R), lambda g, c: (g, 0, 0)),
        scratch_shapes=[pltpu.VMEM((G, R, R), jnp.float32)],
        compiler_params=pltpu.CompilerParams(
            dimension_semantics=("parallel", "arbitrary"),
            vmem_limit_bytes=_VMEM_LIMIT,
        ),
    )(qh, kh)

    ctx = pl.pallas_call(
        _context_kernel,
        out_shape=jax.ShapeDtypeStruct((B, R, K), jnp.float32),
        grid=(B // G, K // KC),
        in_specs=[
            pl.BlockSpec((G, R, R), lambda g, c: (g, 0, 0)),
            pl.BlockSpec((G, R, KC), lambda g, c: (g, 0, c)),
        ],
        out_specs=pl.BlockSpec((G, R, KC), lambda g, c: (g, 0, c)),
        compiler_params=pltpu.CompilerParams(
            dimension_semantics=("parallel", "parallel"),
            vmem_limit_bytes=_VMEM_LIMIT,
        ),
    )(probs, vh)

    return probs, ctx


# ---------------------------------------------------------------------------
# Module wrapper
# ---------------------------------------------------------------------------
def column_self_attention(x, params, num_heads):
    """x: (num_rows R, num_cols C, batch N, embed_dim E) float32."""
    R, C, N, E = x.shape
    Dh = E // num_heads
    H = num_heads
    scaling = (Dh ** -0.5) / math.sqrt(C)   # align_scaling on full num_cols

    # --- fused QKV projection (q-scaling folded into the q weight/bias) --------
    w_qkv_t = jnp.concatenate(
        [params["wq"].T * scaling, params["wk"].T, params["wv"].T], axis=1)   # (E, 3E)
    b_qkv = jnp.concatenate(
        [params["bq"] * scaling, params["bk"], params["bv"]])[None, :]        # (1, 3E)

    M = R * C * N
    xf = x.reshape(M, E)
    qkv = linear(xf, w_qkv_t, b_qkv)                                          # (M, 3E)

    # --- head split: one fused transpose for q/k/v together --------------------
    qkv = qkv.reshape(R, C, N, 3, H, Dh)
    qkv = jnp.transpose(qkv, (3, 4, 2, 0, 1, 5)).reshape(3, H * N, R, C * Dh)
    qh, kh, vh = qkv[0], qkv[1], qkv[2]                                       # (B, R, K)

    # --- attention (fused scores+softmax+context, chunked fallback) ------------
    probs, ctx = _attention(qh, kh, vh)                                       # (B,R,R),(B,R,K)

    # --- head merge + output projection ----------------------------------------
    ctx = ctx.reshape(H, N, R, C, Dh)
    ctx = jnp.transpose(ctx, (2, 3, 1, 0, 4)).reshape(M, E)                   # (i,c,n,h,d)
    out = linear(ctx, params["wo"].T, params["bo"][None, :]).reshape(R, C, N, E)

    attn_probs = probs.reshape(H, N, R, R)                                    # (h,n,i,j)
    return out, attn_probs


# ---------------------------------------------------------------------------
# Pure-JAX reference (mirrors the PyTorch forward exactly)
# ---------------------------------------------------------------------------
def reference(x, params, num_heads):
    R, C, N, E = x.shape
    Dh = E // num_heads
    scaling = (Dh ** -0.5) / math.sqrt(C)

    def lin(t, w, b):
        return t @ w.T + b

    q = lin(x, params["wq"], params["bq"]).reshape(R, C, N, num_heads, Dh) * scaling
    k = lin(x, params["wk"], params["bk"]).reshape(R, C, N, num_heads, Dh)
    v = lin(x, params["wv"], params["bv"]).reshape(R, C, N, num_heads, Dh)
    attn = jnp.einsum("icnhd,jcnhd->hnij", q, k)
    probs = jax.nn.softmax(attn, axis=-1)
    ctx = jnp.einsum("hnij,jcnhd->icnhd", probs, v).reshape(R, C, N, E)
    out = lin(ctx, params["wo"], params["bo"])
    return out, probs


# ---------------------------------------------------------------------------
# Main
# ---------------------------------------------------------------------------
if __name__ == "__main__":
    R, C, N, E, H = 8, 4, 2, 32, 4   # num_rows, num_cols, batch, embed_dim, heads

    key = jax.random.PRNGKey(0)
    keys = jax.random.split(key, 9)
    bound = 1.0 / math.sqrt(E)

    def uinit(k, shape):
        return jax.random.uniform(k, shape, jnp.float32, -bound, bound)

    params = {
        "wq": uinit(keys[0], (E, E)), "bq": uinit(keys[1], (E,)),
        "wk": uinit(keys[2], (E, E)), "bk": uinit(keys[3], (E,)),
        "wv": uinit(keys[4], (E, E)), "bv": uinit(keys[5], (E,)),
        "wo": uinit(keys[6], (E, E)), "bo": uinit(keys[7], (E,)),
    }
    x = jax.random.normal(keys[8], (R, C, N, E), jnp.float32)

    out, probs = column_self_attention(x, params, H)
    out = jax.block_until_ready(out)
    probs = jax.block_until_ready(probs)

    out_ref, probs_ref = reference(x, params, H)
    assert out.shape == (R, C, N, E) and probs.shape == (H, N, R, R)
    np.testing.assert_allclose(np.asarray(out), np.asarray(out_ref), rtol=1e-5, atol=1e-5)
    np.testing.assert_allclose(np.asarray(probs), np.asarray(probs_ref), rtol=1e-5, atol=1e-5)

    print("KERNEL_OK")
</pallas_src>

<mosaic_0001>
module attributes {stable_mosaic.version = 11 : i64} {
  func.func @_linear_kernel(%arg0: i32, %arg1: memref<64x32xf32, #tpu.memory_space<vmem>>, %arg2: memref<32x96xf32, #tpu.memory_space<vmem>>, %arg3: memref<1x96xf32, #tpu.memory_space<vmem>>, %arg4: memref<64x96xf32, #tpu.memory_space<vmem>>) attributes {dimension_semantics = [#tpu.dimension_semantics<parallel>], iteration_bounds = array<i64: 1>, scalar_prefetch = 0 : i64, scratch_operands = 0 : i64, tpu.core_type = #tpu.core_type<tc>, window_params = [{transform_indices = @transform_0, window_bounds = array<i64: 64, 32>}, {pipeline_mode = #tpu.pipeline_mode<synchronous>, transform_indices = @transform_1, window_bounds = array<i64: 32, 96>}, {pipeline_mode = #tpu.pipeline_mode<synchronous>, transform_indices = @transform_2, window_bounds = array<i64: 1, 96>}, {transform_indices = @transform_3, window_bounds = array<i64: 64, 96>}]} {
    %c0 = arith.constant 0 : index
    %c0_0 = arith.constant 0 : index
    %0 = vector.load %arg1[%c0, %c0_0] : memref<64x32xf32, #tpu.memory_space<vmem>>, vector<64x32xf32>
    %c0_1 = arith.constant 0 : index
    %c0_2 = arith.constant 0 : index
    %1 = vector.load %arg2[%c0_1, %c0_2] : memref<32x96xf32, #tpu.memory_space<vmem>>, vector<32x96xf32>
    %cst = arith.constant dense<0.000000e+00> : vector<64x96xf32>
    %2 = tpu.matmul %0, %1, %cst {dimension_numbers = #tpu.dot_dimension_numbers<[1], [0], [0], [1], [0, 0, 1, 1], [], []>} : vector<64x32xf32>, vector<32x96xf32>, vector<64x96xf32> -> vector<64x96xf32>
    %c0_3 = arith.constant 0 : index
    %c0_4 = arith.constant 0 : index
    %3 = vector.load %arg3[%c0_3, %c0_4] : memref<1x96xf32, #tpu.memory_space<vmem>>, vector<1x96xf32>
    %4 = vector.broadcast %3 : vector<1x96xf32> to vector<64x96xf32>
    %5 = arith.addf %2, %4 : vector<64x96xf32>
    %c0_5 = arith.constant 0 : index
    %c0_6 = arith.constant 0 : index
    %6 = vector.load %arg4[%c0_5, %c0_6] : memref<64x96xf32, #tpu.memory_space<vmem>>, vector<64x96xf32>
    tpu.vector_store %arg4[%c0_5, %c0_6], %5 {strides = array<i32>} : memref<64x96xf32, #tpu.memory_space<vmem>>, vector<64x96xf32>,
    return
  }
  func.func @transform_0(%arg0: i32) -> (i32, i32) {
    %c0_i32 = arith.constant 0 : i32
    %c0_i32_0 = arith.constant 0 : i32
    return %arg0, %c0_i32 : i32, i32
  }
  func.func @transform_1(%arg0: i32) -> (i32, i32) {
    %c0_i32 = arith.constant 0 : i32
    %c0_i32_0 = arith.constant 0 : i32
    %c0_i32_1 = arith.constant 0 : i32
    return %c0_i32, %c0_i32_0 : i32, i32
  }
  func.func @transform_2(%arg0: i32) -> (i32, i32) {
    %c0_i32 = arith.constant 0 : i32
    %c0_i32_0 = arith.constant 0 : i32
    %c0_i32_1 = arith.constant 0 : i32
    return %c0_i32, %c0_i32_0 : i32, i32
  }
  func.func @transform_3(%arg0: i32) -> (i32, i32) {
    %c0_i32 = arith.constant 0 : i32
    %c0_i32_0 = arith.constant 0 : i32
    return %arg0, %c0_i32 : i32, i32
  }
}

</mosaic_0001>

<bundles_post_ra>
// kernel: tpu_custom_call.1
= control target key start
LH: loop header
LB: loop body
LE: loop exit
PB: predicated region body
PF: predicated region fallthrough
CT: control target
= control target key end

     0   :  { %s255_s0 = inlined_call_operand.vmem [shape: f32[64,32], index: 0, kind: input, shape index: {}]   ;;  %s256_s1 = inlined_call_operand.vmem [shape: f32[32,96], index: 1, kind: input, shape index: {}]   ;;  %s257_s2 = inlined_call_operand.vmem [shape: f32[1,96], index: 2, kind: input, shape index: {}]   ;;  %s258_s3 = inlined_call_operand.hbm [shape: f32[64,96], index: 3, kind: output, shape index: {}]  }
   0x1   :  { %v26_v0 = vld [vmem:[%s256_s1 + $0x18] sm:$0xff]  ;;  %v25_v1 = vld [vmem:[%s256_s1 + $0x10] sm:$0xff]  ;;  %v24_v2 = vld [vmem:[%s256_s1 + $0x8] sm:$0xff] }
   0x2   :  { %133 = vmatpush.msra.mxu2 %v26_v0  ;;  %134 = vmatpush.msra.mxu3 %v26_v0  ;;  %v23_v3 = vld [vmem:[%s256_s1] sm:$0xff] }
   0x3   :  { %68 = vmatpush.msra.mxu0 %v26_v0  ;;  %132 = vmatpush.msra.mxu1 %v26_v0 }
   0x4   :  { %136 = vmatpush.msra.mxu2 %v25_v1  ;;  %137 = vmatpush.msra.mxu3 %v25_v1 }
   0x5   :  { %69 = vmatpush.msra.mxu0 %v25_v1  ;;  %135 = vmatpush.msra.mxu1 %v25_v1 }
   0x6   :  { %8 = vsyncpa [#allocation3], 0  ;;  %139 = vmatpush.msra.mxu2 %v24_v2  ;;  %140 = vmatpush.msra.mxu3 %v24_v2  ;;  %v19_v4 = vld [vmem:[%s255_s0 + $0x20] sm:$0xff]  ;;  %vm31_vm0 = vcmask 261120   ;;  %v21_v5 = vld [vmem:[%s255_s0 + $0x30] sm:$0xff]  ;;  %vm97_vm1 = vcmask 785408  }
   0x7   :  { %70 = vmatpush.msra.mxu0 %v24_v2  ;;  %138 = vmatpush.msra.mxu1 %v24_v2  ;;  %v15_v6 = vld [vmem:[%s255_s0] sm:$0xff]  ;;  %v17_v7 = vld [vmem:[%s255_s0 + $0x10] sm:$0xff]  ;;  %v20_v8 = vld [vmem:[%s255_s0 + $0x28] sm:$0xff]  ;;  %s112_s12 = sshll.u32 %s258_s3, 4  ;;  %s175_s13 = smov 128   ;;  %s113_s12 = int_to_ptr.hbm [resolvable:$true] %s112_s12 }
   0x8   :  { %142 = vmatpush.msra.mxu2 %v23_v3  ;;  %143 = vmatpush.msra.mxu3 %v23_v3  ;;  %v22_v9 = vld [vmem:[%s255_s0 + $0x38] sm:$0xff]  ;;  %v16_v10 = vld [vmem:[%s255_s0 + $0x8] sm:$0xff]  ;;  %v147_v12 = vld [vmem:[%s257_s2] ss:$0 sm:$0xff]  ;;  %s176_s14 = smov 8  }
   0x9   :  { %128 = vmatmul.msk.f32.vlgmr.msra.gmra.mxu2 %vm31_vm0, %v19_v4  ;;  %130 = vmatmul.msk.f32.vlgmr.msra.gmra.mxu3 %vm31_vm0, %v21_v5  ;;  %v18_v11 = vld [vmem:[%s255_s0 + $0x18] sm:$0xff]  ;;  %s174_s0 = smov [#allocation2]  }
   0xa   :  { %71 = vmatpush.msra.mxu0 %v23_v3  ;;  %141 = vmatpush.msra.mxu1 %v23_v3  ;;  %s110_s2 = sshll.u32 %s174_s0, 4  ;;  %s111_s2 = int_to_ptr.vmem [resolvable:$true] %s110_s2 }
   0xb   :  { %124 = vmatmul.msk.f32.vlgmr.msra.gmra.mxu0 %vm31_vm0, %v15_v6  ;;  %126 = vmatmul.msk.f32.vlgmr.msra.gmra.mxu1 %vm31_vm0, %v17_v7 }
  0x11   :  { %129 = vmatmul.msk.f32.gmra.mxu2 %vm31_vm0, %v20_v8  ;;  %131 = vmatmul.msk.f32.gmra.mxu3 %vm31_vm0, %v22_v9 }
  0x13   :  { %125 = vmatmul.msk.f32.gmra.mxu0 %vm31_vm0, %v16_v10  ;;  %127 = vmatmul.msk.f32.gmra.mxu1 %vm31_vm0, %v18_v11 }
  0x88   :  { %v73_v13 = vpop.f32.mrf.mxu0  ;;  %v79_v14 = vpop.f32.mrf.mxu1 }
  0x89   :  { %v74_v15 = vadd.f32 %v147_v12, %v73_v13  ;;  %v80_v16 = vadd.f32 %v147_v12, %v79_v14 }
  0x8b   :  { %98 = vst.msk [vmem:[#allocation2] sm:$0xff] %vm97_vm1, %v74_v15 }
  0x8c   :  { %100 = vst.msk [vmem:[#allocation2 + $0x10] sm:$0xff] %vm97_vm1, %v80_v16  ;;  %v85_v17 = vpop.f32.mrf.mxu2  ;;  %v91_v18 = vpop.f32.mrf.mxu3 }
  0x8d   :  { %v86_v19 = vadd.f32 %v147_v12, %v85_v17  ;;  %v92_v20 = vadd.f32 %v147_v12, %v91_v18 }
  0x8f   :  { %102 = vst.msk [vmem:[#allocation2 + $0x20] sm:$0xff] %vm97_vm1, %v86_v19 }
  0x90   :  { %104 = vst.msk [vmem:[#allocation2 + $0x30] sm:$0xff] %vm97_vm1, %v92_v20  ;;  %v76_v21 = vpop.f32.mrf.mxu0  ;;  %v82_v22 = vpop.f32.mrf.mxu1 }
  0x91   :  { %v77_v23 = vadd.f32 %v147_v12, %v76_v21  ;;  %v83_v24 = vadd.f32 %v147_v12, %v82_v22 }
  0x93   :  { %99 = vst.msk [vmem:[#allocation2 + $0x8] sm:$0xff] %vm97_vm1, %v77_v23 }
  0x94   :  { %101 = vst.msk [vmem:[#allocation2 + $0x18] sm:$0xff] %vm97_vm1, %v83_v24  ;;  %v88_v25 = vpop.f32.mrf.mxu2  ;;  %v94_v26 = vpop.f32.mrf.mxu3 }
  0x95   :  { %v89_v27 = vadd.f32 %v147_v12, %v88_v25  ;;  %v95_v28 = vadd.f32 %v147_v12, %v94_v26 }
  0x97   :  { %103 = vst.msk [vmem:[#allocation2 + $0x28] sm:$0xff] %vm97_vm1, %v89_v27 }
  0x98   :  { %105 = vst.msk [vmem:[#allocation2 + $0x38] sm:$0xff] %vm97_vm1, %v95_v28 }
  0x99   :  { %118 = dma.vmem_to_hbm [thread:$0]  %s111_s2, 1024, %s113_s12, [#allocation3], %s175_s13, %s175_s13, %s176_s14  }
  0x9a   :  { %172 = dma.done.wait [#allocation3], 1024  }
  0x9b   :  { %173 = vsyncadd [#allocation3], 4294966272 }
  0x9c   :  { %123 = vsyncpa [#allocation3], 1 }

</bundles_post_ra>
